<compile_context>
chip_gen: v7x
topology: tpu7x:2x2x1
jax: 0.10.0
libtpu: 0.0.40
codegen_flags: <defaults>
</compile_context>

<pallas_src>
import math

import jax
import jax.numpy as jnp
from jax.experimental import pallas as pl
from jax.experimental.pallas import tpu as pltpu


def _round_up(x, m):
    return ((x + m - 1) // m) * m


def _gradient_kernel(x_ref, a_ref, b_ref, c_ref, o_ref):
    """out = x + sigmoid(x @ A + b) @ C   (A, b, C stay VMEM-resident)."""
    x = x_ref[...].astype(jnp.float32)
    h = jnp.dot(x, a_ref[...], preferred_element_type=jnp.float32) + b_ref[...]
    act = jax.nn.sigmoid(h)
    upd = jnp.dot(act, c_ref[...], preferred_element_type=jnp.float32)
    o_ref[...] = (x + upd).astype(o_ref.dtype)


def init_gradient_params(key, dim, s=1, width=10, h=0.01, dtype=jnp.float32):
    """Deterministic stand-in for the torch.randn parameter init."""
    k1_key, b_key, k2_key = jax.random.split(key, 3)
    return {
        "K1": jax.random.normal(k1_key, (dim - s, width), dtype=dtype),
        "b": jax.random.normal(b_key, (width,), dtype=dtype),
        "K2": jax.random.normal(k2_key, (width, s), dtype=dtype) * h,
    }


def _padded_weights(params, dim, i, s):
    """Fold the module's feature-axis slicing into zero-padded weights."""
    k1 = params["K1"].astype(jnp.float32)          # [dim - s, width]
    k2 = params["K2"].astype(jnp.float32)          # [width, s]
    b = params["b"].astype(jnp.float32)            # [width]
    width = k1.shape[1]
    # x @ K1_pad == q @ K1   where q = cat(x[:, :i], x[:, i+s:])
    k1_pad = jnp.concatenate(
        [k1[:i], jnp.zeros((s, width), jnp.float32), k1[i:]], axis=0)   # [dim, width]
    # a @ K2_pad scatters the update into columns i..i+s only
    k2_pad = jnp.zeros((width, dim), jnp.float32).at[:, i:i + s].set(k2)  # [width, dim]
    return k1_pad, b, k2_pad


def gradient_module_forward(x, params, *, mode=0, s=1, block_rows=2048):
    """Pallas implementation of GradientModule.forward (feature-last layout)."""
    i = int(mode)
    orig_shape = x.shape
    dim = orig_shape[-1]
    assert 0 <= i and i + s <= dim, "invalid (mode, s) for dim"

    x2 = x.reshape(-1, dim)
    n = x2.shape[0]

    k1_pad, b, k2_pad = _padded_weights(params, dim, i, s)
    width = k1_pad.shape[1]

    # Lane packing: fold R consecutive rows into one 128-lane-aligned row
    # (free, contiguity-preserving reshape); weights become block-diagonal.
    r = 128 // math.gcd(dim, 128)
    if r * dim > 512:          # awkward dims would blow up the block-diag weights
        r = 1
    n_pad = _round_up(n, r)
    if n_pad != n:
        x2 = jnp.pad(x2, ((0, n_pad - n), (0, 0)))
    m = n_pad // r
    w_in = r * dim
    w_hid = r * width

    if r > 1:
        eye = jnp.eye(r, dtype=jnp.float32)
        a_mat = jnp.kron(eye, k1_pad)                    # [r*dim,   r*width]
        c_mat = jnp.kron(eye, k2_pad)                    # [r*width, r*dim]
        b_vec = jnp.tile(b, r).reshape(1, w_hid)         # [1, r*width]
        xk = x2.reshape(m, w_in)
    else:
        a_mat, c_mat, b_vec = k1_pad, k2_pad, b.reshape(1, width)
        xk = x2

    block_rows = max(8, (int(block_rows) // 8) * 8)      # keep (8,128) tiling legal
    tile_m = m if m <= block_rows else block_rows
    grid = (pl.cdiv(m, tile_m),)

    y = pl.pallas_call(
        _gradient_kernel,
        out_shape=jax.ShapeDtypeStruct((m, w_in), x.dtype),
        grid=grid,
        in_specs=[
            pl.BlockSpec((tile_m, w_in), lambda g: (g, 0)),   # x tile (streamed)
            pl.BlockSpec((w_in, w_hid), lambda g: (0, 0)),    # A (resident)
            pl.BlockSpec((1, w_hid), lambda g: (0, 0)),       # b (resident)
            pl.BlockSpec((w_hid, w_in), lambda g: (0, 0)),    # C (resident)
        ],
        out_specs=pl.BlockSpec((tile_m, w_in), lambda g: (g, 0)),
        compiler_params=pltpu.CompilerParams(
            dimension_semantics=("parallel",),                # megacore on v7x
        ),
    )(xk, a_mat, b_vec, c_mat)

    y2 = y.reshape(n_pad, dim)
    if n_pad != n:
        y2 = y2[:n]
    return y2.reshape(orig_shape)


def gradient_module_reference(x, params, *, mode=0, s=1):
    """Pure-JAX reference (mirrors the PyTorch forward exactly)."""
    i = int(mode)
    p = x[..., i:i + s]
    q = jnp.concatenate([x[..., :i], x[..., i + s:]], -1)
    sub = jax.nn.sigmoid(q @ params["K1"] + params["b"]) @ params["K2"]
    return jnp.concatenate([x[..., :i], p + sub, x[..., i + s:]], -1)


if __name__ == "__main__":
    key = jax.random.PRNGKey(0)
    pkey, xkey = jax.random.split(key)

    # Config 1: dim=8 (lane-packed path, R=16), mode=0, tiny batch that needs row padding.
    dim, s, mode, width, h = 8, 1, 0, 10, 0.01
    params = init_gradient_params(pkey, dim, s=s, width=width, h=h)
    x = jax.random.normal(xkey, (2, 4, dim), dtype=jnp.float32)
    y = jax.block_until_ready(gradient_module_forward(x, params, mode=mode, s=s))
    y_ref = gradient_module_reference(x, params, mode=mode, s=s)
    assert y.shape == x.shape
    assert jnp.allclose(y, y_ref, atol=1e-5, rtol=1e-5)

    # Config 2: non-zero mode, enough rows for a multi-step pipelined grid.
    x2 = jax.random.normal(jax.random.fold_in(xkey, 1), (4, 128, dim), dtype=jnp.float32)
    y2 = jax.block_until_ready(
        gradient_module_forward(x2, params, mode=3, s=s, block_rows=8))
    y2_ref = gradient_module_reference(x2, params, mode=3, s=s)
    assert jnp.allclose(y2, y2_ref, atol=1e-5, rtol=1e-5)

    # Config 3: dim that does not pack into 128 lanes -> unpacked fallback path.
    dim3 = 7
    params3 = init_gradient_params(jax.random.fold_in(pkey, 3), dim3, s=s, width=width, h=h)
    x3 = jax.random.normal(jax.random.fold_in(xkey, 2), (2, 5, dim3), dtype=jnp.float32)
    y3 = jax.block_until_ready(gradient_module_forward(x3, params3, mode=2, s=s))
    y3_ref = gradient_module_reference(x3, params3, mode=2, s=s)
    assert jnp.allclose(y3, y3_ref, atol=1e-5, rtol=1e-5)

    print("KERNEL_OK")
</pallas_src>

<mosaic_0001>
module attributes {stable_mosaic.version = 11 : i64} {
  func.func @_gradient_kernel(%arg0: i32, %arg1: memref<1x128xf32, #tpu.memory_space<vmem>>, %arg2: memref<128x160xf32, #tpu.memory_space<vmem>>, %arg3: memref<1x160xf32, #tpu.memory_space<vmem>>, %arg4: memref<160x128xf32, #tpu.memory_space<vmem>>, %arg5: memref<1x128xf32, #tpu.memory_space<vmem>>) attributes {dimension_semantics = [#tpu.dimension_semantics<parallel>], iteration_bounds = array<i64: 1>, scalar_prefetch = 0 : i64, scratch_operands = 0 : i64, tpu.core_type = #tpu.core_type<tc>, window_params = [{transform_indices = @transform_0, window_bounds = array<i64: 1, 128>}, {pipeline_mode = #tpu.pipeline_mode<synchronous>, transform_indices = @transform_1, window_bounds = array<i64: 128, 160>}, {pipeline_mode = #tpu.pipeline_mode<synchronous>, transform_indices = @transform_2, window_bounds = array<i64: 1, 160>}, {pipeline_mode = #tpu.pipeline_mode<synchronous>, transform_indices = @transform_3, window_bounds = array<i64: 160, 128>}, {transform_indices = @transform_4, window_bounds = array<i64: 1, 128>}]} {
    %c0 = arith.constant 0 : index
    %c0_0 = arith.constant 0 : index
    %0 = vector.load %arg1[%c0, %c0_0] : memref<1x128xf32, #tpu.memory_space<vmem>>, vector<1x128xf32>
    %c0_1 = arith.constant 0 : index
    %c0_2 = arith.constant 0 : index
    %1 = vector.load %arg2[%c0_1, %c0_2] : memref<128x160xf32, #tpu.memory_space<vmem>>, vector<128x160xf32>
    %cst = arith.constant dense<0.000000e+00> : vector<1x160xf32>
    %2 = tpu.matmul %0, %1, %cst {dimension_numbers = #tpu.dot_dimension_numbers<[1], [0], [0], [1], [0, 0, 1, 1], [], []>} : vector<1x128xf32>, vector<128x160xf32>, vector<1x160xf32> -> vector<1x160xf32>
    %c0_3 = arith.constant 0 : index
    %c0_4 = arith.constant 0 : index
    %3 = vector.load %arg3[%c0_3, %c0_4] : memref<1x160xf32, #tpu.memory_space<vmem>>, vector<1x160xf32>
    %4 = arith.addf %2, %3 : vector<1x160xf32>
    %5 = arith.negf %4 : vector<1x160xf32>
    %6 = math.exp %5 : vector<1x160xf32>
    %cst_5 = arith.constant 1.000000e+00 : f32
    %7 = vector.broadcast %cst_5 : f32 to vector<1x160xf32>
    %8 = arith.addf %7, %6 : vector<1x160xf32>
    %9 = arith.divf %7, %8 : vector<1x160xf32>
    %c0_6 = arith.constant 0 : index
    %c0_7 = arith.constant 0 : index
    %10 = vector.load %arg4[%c0_6, %c0_7] : memref<160x128xf32, #tpu.memory_space<vmem>>, vector<160x128xf32>
    %cst_8 = arith.constant dense<0.000000e+00> : vector<1x128xf32>
    %11 = tpu.matmul %9, %10, %cst_8 {dimension_numbers = #tpu.dot_dimension_numbers<[1], [0], [0], [1], [0, 0, 1, 1], [], []>} : vector<1x160xf32>, vector<160x128xf32>, vector<1x128xf32> -> vector<1x128xf32>
    %12 = arith.addf %0, %11 : vector<1x128xf32>
    %c0_9 = arith.constant 0 : index
    %c0_10 = arith.constant 0 : index
    %13 = vector.load %arg5[%c0_9, %c0_10] : memref<1x128xf32, #tpu.memory_space<vmem>>, vector<1x128xf32>
    tpu.vector_store %arg5[%c0_9, %c0_10], %12 {strides = array<i32>} : memref<1x128xf32, #tpu.memory_space<vmem>>, vector<1x128xf32>,
    return
  }
  func.func @transform_0(%arg0: i32) -> (i32, i32) {
    %c0_i32 = arith.constant 0 : i32
    %c0_i32_0 = arith.constant 0 : i32
    return %arg0, %c0_i32 : i32, i32
  }
  func.func @transform_1(%arg0: i32) -> (i32, i32) {
    %c0_i32 = arith.constant 0 : i32
    %c0_i32_0 = arith.constant 0 : i32
    %c0_i32_1 = arith.constant 0 : i32
    return %c0_i32, %c0_i32_0 : i32, i32
  }
  func.func @transform_2(%arg0: i32) -> (i32, i32) {
    %c0_i32 = arith.constant 0 : i32
    %c0_i32_0 = arith.constant 0 : i32
    %c0_i32_1 = arith.constant 0 : i32
    return %c0_i32, %c0_i32_0 : i32, i32
  }
  func.func @transform_3(%arg0: i32) -> (i32, i32) {
    %c0_i32 = arith.constant 0 : i32
    %c0_i32_0 = arith.constant 0 : i32
    %c0_i32_1 = arith.constant 0 : i32
    return %c0_i32, %c0_i32_0 : i32, i32
  }
  func.func @transform_4(%arg0: i32) -> (i32, i32) {
    %c0_i32 = arith.constant 0 : i32
    %c0_i32_0 = arith.constant 0 : i32
    return %arg0, %c0_i32 : i32, i32
  }
}

</mosaic_0001>

<bundles_post_ra>
// kernel: tpu_custom_call.1
= control target key start
LH: loop header
LB: loop body
LE: loop exit
PB: predicated region body
PF: predicated region fallthrough
CT: control target
= control target key end

     0   :  { %v356_v7 = vmov 0.0   ;;  %v357_v8 = vmov 0.0|0.0   ;;  %s572_s0 = inlined_call_operand.vmem [shape: f32[1,128], index: 0, kind: input, shape index: {}]   ;;  %s573_s1 = inlined_call_operand.vmem [shape: f32[128,160], index: 1, kind: input, shape index: {}]   ;;  %s574_s2 = inlined_call_operand.vmem [shape: f32[1,160], index: 2, kind: input, shape index: {}]   ;;  %s575_s3 = inlined_call_operand.vmem [shape: f32[160,128], index: 3, kind: input, shape index: {}]   ;;  %s576_s4 = inlined_call_operand.hbm [shape: f32[1,128], index: 4, kind: output, shape index: {}]  }
   0x1   :  { %v20_v0 = vld [vmem:[%s573_s1 + $0x8] sm:$0xff]  ;;  %v22_v1 = vld [vmem:[%s573_s1 + $0x18] sm:$0xff]  ;;  %v19_v2 = vld [vmem:[%s573_s1] sm:$0xff]  ;;  %127 = vmatprep.mubr.f32.mxu0 %v356_v7  ;;  %291 = vmatprep.subr.bf16.mxu1 %v357_v8 }
   0x2   :  { %v259_v3 = vpack.c.bf16 %v22_v1, %v20_v0  ;;  %v21_v4 = vld [vmem:[%s573_s1 + $0x10] sm:$0xff]  ;;  %v24_v5 = vld [vmem:[%s573_s1 + $0x28] sm:$0xff]  ;;  %v26_v6 = vld [vmem:[%s573_s1 + $0x38] sm:$0xff] }
   0x3   :  { %v261_v9 = vpack.c.bf16 %v21_v4, %v19_v2  ;;  %v263_v10 = vpack.c.bf16 %v26_v6, %v24_v5  ;;  %v23_v11 = vld [vmem:[%s573_s1 + $0x20] sm:$0xff]  ;;  %v25_v12 = vld [vmem:[%s573_s1 + $0x30] sm:$0xff]  ;;  %v28_v13 = vld [vmem:[%s573_s1 + $0x48] sm:$0xff] }
   0x4   :  { %260 = vmatprep.subr.bf16.mxu0 %v259_v3  ;;  %v30_v14 = vld [vmem:[%s573_s1 + $0x58] sm:$0xff]  ;;  %v265_v15 = vpack.c.bf16 %v25_v12, %v23_v11  ;;  %v27_v17 = vld [vmem:[%s573_s1 + $0x40] sm:$0xff]  ;;  %v29_v18 = vld [vmem:[%s573_s1 + $0x50] sm:$0xff] }
   0x5   :  { %262 = vmatpush1.bf16.msra.mxu0 %v261_v9  ;;  %v267_v16 = vpack.c.bf16 %v30_v14, %v28_v13  ;;  %v32_v19 = vld [vmem:[%s573_s1 + $0x68] sm:$0xff]  ;;  %v34_v20 = vld [vmem:[%s573_s1 + $0x78] sm:$0xff]  ;;  %v269_v21 = vpack.c.bf16 %v29_v18, %v27_v17  ;;  %v31_v23 = vld [vmem:[%s573_s1 + $0x60] sm:$0xff] }
   0x6   :  { %264 = vmatprep.subr.bf16.mxu0 %v263_v10  ;;  %v271_v22 = vpack.c.bf16 %v34_v20, %v32_v19  ;;  %v33_v24 = vld [vmem:[%s573_s1 + $0x70] sm:$0xff]  ;;  %v36_v25 = vld [vmem:[%s573_s1 + $0x88] sm:$0xff]  ;;  %v38_v26 = vld [vmem:[%s573_s1 + $0x98] sm:$0xff] }
   0x7   :  { %v146_v27 = vld [vmem:[%s575_s3] sm:$0xff]  ;;  %v147_v28 = vld [vmem:[%s575_s3 + $0x8] sm:$0xff]  ;;  %v148_v29 = vld [vmem:[%s575_s3 + $0x10] sm:$0xff]  ;;  %v273_v30 = vpack.c.bf16 %v33_v24, %v31_v23 }
   0x8   :  { %v292_v31 = vpack.c.bf16 %v147_v28, %v146_v27  ;;  %v149_v32 = vld [vmem:[%s575_s3 + $0x18] sm:$0xff] }
   0x9   :  { %266 = vmatpush1.bf16.msra.mxu0 %v265_v15 }
   0xa   :  { %268 = vmatprep.subr.bf16.mxu0 %v267_v16 }
   0xd   :  { %270 = vmatpush1.bf16.msra.mxu0 %v269_v21 }
   0xe   :  { %9 = vsyncpa [#allocation3], 0  ;;  %272 = vmatprep.subr.bf16.mxu0 %v271_v22  ;;  %v275_v33 = vpack.c.bf16 %v38_v26, %v36_v25  ;;  %v35_v34 = vld [vmem:[%s573_s1 + $0x80] sm:$0xff]  ;;  %v37_v35 = vld [vmem:[%s573_s1 + $0x90] sm:$0xff]  ;;  %293 = vmatpush1.bf16.msra.mxu1 %v292_v31  ;;  %v295_v38 = vpack.c.bf16 %v149_v32, %v148_v29  ;;  %v53_v18 = vlaneseq  ;;  %vm166_vm0 = vcmask 261120  }
   0xf   :  { %v40_v36 = vld [vmem:[%s573_s1 + $0xa8] sm:$0xff]  ;;  %v42_v37 = vld [vmem:[%s573_s1 + $0xb8] sm:$0xff]  ;;  %294 = vmatprep.subr.bf16.mxu1 %v357_v8  ;;  %v277_v39 = vpack.c.bf16 %v37_v35, %v35_v34  ;;  %v39_v41 = vld [vmem:[%s573_s1 + $0xa0] sm:$0xff] }
  0x10   :  { %v279_v40 = vpack.c.bf16 %v42_v37, %v40_v36  ;;  %v41_v42 = vld [vmem:[%s573_s1 + $0xb0] sm:$0xff]  ;;  %v44_v43 = vld [vmem:[%s573_s1 + $0xc8] sm:$0xff]  ;;  %v46_v44 = vld [vmem:[%s573_s1 + $0xd8] sm:$0xff]  ;;  %v54_v19 = vshrl.u32 %v53_v18, 7 }
  0x11   :  { %274 = vmatpush1.bf16.msra.mxu0 %v273_v30  ;;  %v281_v45 = vpack.c.bf16 %v41_v42, %v39_v41  ;;  %v283_v46 = vpack.c.bf16 %v46_v44, %v44_v43  ;;  %v43_v47 = vld [vmem:[%s573_s1 + $0xc0] sm:$0xff]  ;;  %v45_v48 = vld [vmem:[%s573_s1 + $0xd0] sm:$0xff]  ;;  %v48_v49 = vld [vmem:[%s573_s1 + $0xe8] sm:$0xff] }
  0x12   :  { %276 = vmatprep.subr.bf16.mxu0 %v275_v33  ;;  %296 = vmatpush1.bf16.msra.mxu1 %v295_v38  ;;  %v50_v50 = vld [vmem:[%s573_s1 + $0xf8] sm:$0xff]  ;;  %v285_v51 = vpack.c.bf16 %v45_v48, %v43_v47  ;;  %v47_v53 = vld [vmem:[%s573_s1 + $0xe0] sm:$0xff]  ;;  %v49_v54 = vld [vmem:[%s573_s1 + $0xf0] sm:$0xff]  ;;  %v55_v20 = vsub.s32 0, %v54_v19  ;;  %v59_v22 = vsub.s32 1, %v54_v19 }
  0x13   :  { %297 = vmatprep.subr.bf16.mxu1 %v357_v8  ;;  %v287_v52 = vpack.c.bf16 %v50_v50, %v48_v49  ;;  %v289_v55 = vpack.c.bf16 %v49_v54, %v47_v53  ;;  %v498_v56 = vld [vmem:[%s572_s0] sm:$0x1]  ;;  %v151_v58 = vld [vmem:[%s575_s3 + $0x28] sm:$0xff]  ;;  %v152_v60 = vld [vmem:[%s575_s3 + $0x30] sm:$0xff] }
  0x14   :  { %v150_v57 = vld [vmem:[%s575_s3 + $0x20] sm:$0xff]  ;;  %v153_v61 = vld [vmem:[%s575_s3 + $0x38] sm:$0xff]  ;;  %v155_v0 = vld [vmem:[%s575_s3 + $0x48] sm:$0xff] }
  0x15   :  { %278 = vmatpush1.bf16.msra.mxu0 %v277_v39  ;;  %v298_v59 = vpack.c.bf16 %v151_v58, %v150_v57  ;;  %v301_v62 = vpack.c.bf16 %v153_v61, %v152_v60  ;;  %v154_v63 = vld [vmem:[%s575_s3 + $0x40] sm:$0xff]  ;;  %v156_v2 = vld [vmem:[%s575_s3 + $0x50] sm:$0xff]  ;;  %v157_v3 = vld [vmem:[%s575_s3 + $0x58] sm:$0xff] }
  0x16   :  { %280 = vmatprep.subr.bf16.mxu0 %v279_v40  ;;  %v304_v1 = vpack.c.bf16 %v155_v0, %v154_v63  ;;  %v307_v4 = vpack.c.bf16 %v157_v3, %v156_v2  ;;  %v158_v5 = vld [vmem:[%s575_s3 + $0x60] sm:$0xff]  ;;  %v159_v6 = vld [vmem:[%s575_s3 + $0x68] sm:$0xff]  ;;  %v160_v9 = vld [vmem:[%s575_s3 + $0x70] sm:$0xff] }
  0x17   :  { %299 = vmatpush1.bf16.msra.mxu1 %v298_v59  ;;  %v310_v7 = vpack.c.bf16 %v159_v6, %v158_v5  ;;  %v161_v10 = vld [vmem:[%s575_s3 + $0x78] sm:$0xff]  ;;  %v162_v12 = vld [vmem:[%s575_s3 + $0x80] sm:$0xff]  ;;  %v163_v13 = vld [vmem:[%s575_s3 + $0x88] sm:$0xff] }
  0x18   :  { %300 = vmatprep.subr.bf16.mxu1 %v357_v8  ;;  %v313_v11 = vpack.c.bf16 %v161_v10, %v160_v9  ;;  %v316_v14 = vpack.c.bf16 %v163_v13, %v162_v12  ;;  %v164_v15 = vld [vmem:[%s575_s3 + $0x90] sm:$0xff]  ;;  %v165_v16 = vld [vmem:[%s575_s3 + $0x98] sm:$0xff]  ;;  %v51_v21 = vld [vmem:[%s574_s2] sm:$0x3]  ;;  %s358_s2 = smov [#allocation2]  }
  0x19   :  { %282 = vmatpush1.bf16.msra.mxu0 %v281_v45  ;;  %v319_v17 = vpack.c.bf16 %v165_v16, %v164_v15  ;;  %v56_v23 = vrot.slane %v51_v21, %v55_v20  ;;  %v60_v24 = vrot.slane %v51_v21, %v59_v22  ;;  %s248_s3 = sshll.u32 %s358_s2, 4  ;;  %s249_s3 = int_to_ptr.vmem [resolvable:$true] %s248_s3 }
  0x1a   :  { %284 = vmatprep.subr.bf16.mxu0 %v283_v46  ;;  %s332_s0 = scalar_lea.vmem %s249_s3, 16  ;;  %s336_s16 = scalar_lea.vmem %s249_s3, 32 }
  0x1b   :  { %302 = vmatpush1.bf16.msra.mxu1 %v301_v62  ;;  %p333_p0 = scmp.ne.s32.totalorder %s249_s3, %s332_s0  ;;  %p337_p1 = scmp.lt.s32.totalorder %s249_s3, %s249_s3 }
  0x1c   :  { %303 = vmatprep.subr.bf16.mxu1 %v357_v8  ;;  %p338_p2 = scmp.lt.s32.totalorder %s336_s16, %s332_s0 }
  0x1d   :  { %286 = vmatpush1.bf16.msra.mxu0 %v285_v51 }
  0x1e   :  { %288 = vmatprep.subr.bf16.mxu0 %v287_v52  ;;  %p339_p3 = por %p338_p2, %p337_p1 }
  0x1f   :  { %305 = vmatpush1.bf16.msra.mxu1 %v304_v1 }
  0x20   :  { %306 = vmatprep.subr.bf16.mxu1 %v357_v8  ;;  %p340_p4 = pnand %p339_p3, %p333_p0 }
  0x21   :  { %290 = vmatpush1.bf16.msra.mxu0 %v289_v55 }
  0x23   :  { %308 = vmatpush1.bf16.msra.mxu1 %v307_v4 }
  0x24   :  { %128 = vmatmul.mubr.f32.vlgmr.msra.gmra.mrb[0].mxu0 %v498_v56  ;;  %309 = vmatprep.subr.bf16.mxu1 %v357_v8 }
  0x27   :  { %311 = vmatpush1.bf16.msra.mxu1 %v310_v7 }
  0x28   :  { %312 = vmatprep.subr.bf16.mxu1 %v357_v8 }
  0x2b   :  { %314 = vmatpush1.bf16.msra.mxu1 %v313_v11 }
  0x2c   :  { %315 = vmatprep.subr.bf16.mxu1 %v357_v8 }
  0x2f   :  { %317 = vmatpush1.bf16.msra.mxu1 %v316_v14 }
  0x30   :  { %318 = vmatprep.subr.bf16.mxu1 %v357_v8 }
  0x33   :  { %320 = vmatpush1.bf16.msra.mxu1 %v319_v17 }
  0xf7   :  { %v129_v25 = vpop.f32.mrb[0].mxu0 }
  0xf8   :  { %v130_v26 = vadd.f32 %v129_v25, %v56_v23  ;;  %v131_v27 = vpop.f32.mrb[1].mxu0 }
  0xf9   :  { %v132_v28 = vadd.f32 %v131_v27, %v60_v24 }
  0xfa   :  { %v256_v29 = vmul.f32 -1.442695, %v130_v26 }
  0xfb   :  { %v257_v30 = vmul.f32 -1.442695, %v132_v28 }
  0xfc   :  { %324 = vpow2.f32 %v256_v29 }
  0xfd   :  { %326 = vpow2.f32 %v257_v30 }
 0x106   :  { %v325_v8 = vpop.eup %324 }
 0x107   :  { %v327_v31 = vpop.eup %326  ;;  %v140_v32 = vadd.f32 1.0, %v325_v8 }
 0x108   :  { %v141_v33 = vadd.f32 1.0, %v327_v31 }
 0x10a   :  { %328 = vrcp.f32 %v141_v33 }
 0x10b   :  { %330 = vrcp.f32 %v140_v32 }
 0x114   :  { %v329_v34 = vpop.eup %328 }
 0x115   :  { %v331_v35 = vpop.eup %330  ;;  %258 = vmatprep.mubr.msk.f32.mxu1 %vm166_vm0, %v329_v34 }
 0x116   :  { %235 = vmatmul.mubr.f32.vlgmr.msra.gmra.mrb[0].mxu1 %v331_v35 }
 0x1e9   :  { %v236_v36 = vpop.f32.mrb[0].mxu1 }
 0x1ea   :  { %v240_v37 = vadd.f32 %v236_v36, %v498_v56  ;;  %v238_v38 = vpop.f32.mrb[1].mxu1 }
 0x1ec   :  { %241 = vst [vmem:[#allocation2] sm:$0x1] %v240_v37 }
 0x1ed   :  { %343 = shalt.err (!%p340_p4)
}
 0x1ee   :  { %s344_s19 = scalar_lea.hbm %s576_s4, 16 }
 0x1ef   :  { %p345_p5 = scmp.ne.s32.totalorder %s576_s4, %s344_s19  ;;  %p348_p6 = scmp.lt.u32.totalorder %s344_s19, %s576_s4 }
 0x1f1   :  { %p350_p7 = pnand %p348_p6, %p345_p5 }
 0x1f3   :  { %353 = shalt.err (!%p350_p7)
}
 0x1f4   :  { %251 = dma.vmem_to_hbm [thread:$0]  %s249_s3, 16, %s576_s4, [#allocation3]  }
 0x1f5   :  { %354 = dma.done.wait [#allocation3], 16  }
 0x1f6   :  { %355 = vsyncadd [#allocation3], 4294967280 }
 0x1f7   :  { %255 = vsyncpa [#allocation3], 1 }

</bundles_post_ra>
